<compile_context>
chip_gen: v5e
topology: v5e:2x2
jax: 0.10.0
libtpu: 0.0.40
codegen_flags: <defaults>
</compile_context>

<pallas_src>
import jax
import jax.numpy as jnp
from jax.experimental import pallas as pl
from jax.experimental.pallas import tpu as pltpu

# FastKAN RBF constants (fixed, non-trainable buffers) baked into the kernel.
GRID_MIN, GRID_MAX, NUM_GRIDS = -2.0, 2.0, 5
GRID_VALS = tuple(
    GRID_MIN + i * (GRID_MAX - GRID_MIN) / (NUM_GRIDS - 1) for i in range(NUM_GRIDS)
)
DENOM = (GRID_MAX - GRID_MIN) / (NUM_GRIDS - 1)
INV_DENOM = 1.0 / DENOM
LN_EPS = 1e-5

_VMEM_LIMIT_BYTES = 48 * 1024 * 1024   # explicit; headroom under v7x's 64 MiB physical


# ----------------------------------------------------------------------------
# In-kernel math helpers (f32 everywhere; only matmul inputs become bf16).
# ----------------------------------------------------------------------------
def _sigmoid_fast(z):
    """sigmoid(z) = 1/(1+exp(-z)) via one EUP exp + near-free approx reciprocal."""
    t = jnp.exp(-jnp.clip(z, -30.0, 30.0))          # clip: keep exp finite
    return pl.reciprocal(1.0 + t, approx=True)


def _tanh_fast(z):
    """tanh(z) = (1 - exp(-2z)) / (1 + exp(-2z)) via one exp + approx reciprocal."""
    t = jnp.exp(-2.0 * jnp.clip(z, -20.0, 20.0))
    return (1.0 - t) * pl.reciprocal(1.0 + t, approx=True)


def _fused_basis(z, lnw_s, lnb_s, offs):
    """LayerNorm -> all-grid RBF basis (replicate + subtract) with SiLU(z) appended.

    z     : (bb, d)        un-normalized layer input (f32)
    lnw_s : (1, d)         LayerNorm weight, pre-scaled by 1/DENOM at pack time
    lnb_s : (1, d)         LayerNorm bias,   pre-scaled by 1/DENOM at pack time
    offs  : (1, G*d)       grid values (scaled by 1/DENOM), grid-major replication
    returns (bb, (G+1)*d) f32.
    """
    mean = jnp.mean(z, axis=-1, keepdims=True)
    var = jnp.maximum(jnp.mean(z * z, axis=-1, keepdims=True) - mean * mean, 0.0)
    zn_s = (z - mean) * jax.lax.rsqrt(var + LN_EPS) * lnw_s + lnb_s   # == LN(z)/DENOM
    # Replicate once (identical pieces -> no per-grid arithmetic), subtract offsets.
    rep = jnp.concatenate([zn_s] * NUM_GRIDS, axis=-1)                # (bb, G*d)
    arg = rep - offs
    rbf = jnp.exp(-(arg * arg))                                       # one exp, all grids
    silu = z * _sigmoid_fast(z)                                       # base path on raw z
    return jnp.concatenate([rbf, silu], axis=-1)                      # (bb, (G+1)*d)


# ----------------------------------------------------------------------------
# Kernel factory + wrapper.
# ----------------------------------------------------------------------------
def _make_kernel(d_in, hid, kh, pad):
    gd_in, gd_h, gd_k = NUM_GRIDS * d_in, NUM_GRIDS * hid, NUM_GRIDS * kh

    def kernel(x_ref, h_ref, c_ref, w1x_ref, w1h_ref, w2x_ref, w2h_ref,
               vec_ref, out_ref):
        x_t = x_ref[...]
        h_t = h_ref[...]
        c_t = c_ref[...]
        v = vec_ref[...]                                              # (14, maxw) f32

        # ---- KAN_x / KAN_h layer 1: one fused [spline|base] bf16 matmul each ----
        b1x = _fused_basis(x_t, v[0:1, :d_in], v[1:2, :d_in], v[11:12, :gd_in])
        zx = jnp.dot(b1x.astype(jnp.bfloat16), w1x_ref[...],
                     preferred_element_type=jnp.float32) + v[8:9, :kh]
        b1h = _fused_basis(h_t, v[2:3, :hid], v[3:4, :hid], v[12:13, :gd_h])
        zh = jnp.dot(b1h.astype(jnp.bfloat16), w1h_ref[...],
                     preferred_element_type=jnp.float32) + v[9:10, :kh]

        # ---- Layer 2: two dots summed into one accumulator (no lane concat) ----
        b2x = _fused_basis(zx, v[4:5, :kh], v[5:6, :kh], v[13:14, :gd_k])
        b2h = _fused_basis(zh, v[6:7, :kh], v[7:8, :kh], v[13:14, :gd_k])
        z = (jnp.dot(b2x.astype(jnp.bfloat16), w2x_ref[...],
                     preferred_element_type=jnp.float32)
             + jnp.dot(b2h.astype(jnp.bfloat16), w2h_ref[...],
                       preferred_element_type=jnp.float32)
             + v[10:11, :hid])

        # ---- Gating: sigmoid(z) AND tanh(z) from a single exp ----
        zc = jnp.clip(z, -20.0, 20.0)
        t = jnp.exp(-zc)
        gate = pl.reciprocal(1.0 + t, approx=True)                    # sigmoid(z)
        t2 = t * t
        c_tilde = (1.0 - t2) * pl.reciprocal(1.0 + t2, approx=True)   # tanh(z)
        c_next = gate * (c_t + c_tilde)                               # f*c + i*c_tilde
        h_next = gate * _tanh_fast(c_next)                            # o * tanh(c_next)

        # Lane-dense fused output [h_next | c_next | 0-pad].
        if pad > 0:
            hc = jnp.concatenate(
                [h_next, c_next, jnp.zeros((h_next.shape[0], pad), jnp.float32)],
                axis=-1)
        else:
            hc = jnp.concatenate([h_next, c_next], axis=-1)
        out_ref[...] = hc.astype(out_ref.dtype)

    return kernel


def _pick_batch_tile(B, d_in, hid, kh, act_budget_bytes):
    """VMEM-aware batch tile: largest 8-aligned divisor whose live f32
    intermediates fit the activation budget; prefer >= 2 grid steps (v7x 2 TCs)."""
    row_bytes = 4 * ((NUM_GRIDS + 1) * (d_in + hid + 2 * kh)   # the four basis tensors
                     + 4 * kh + 10 * hid + 2 * d_in)           # z's, gates, h/c, slack
    cap = max(8, int(act_budget_bytes) // max(row_bytes, 1))
    bb = B
    if B > cap:
        for cand in (2048, 1024, 512, 256, 128, 64, 32, 16, 8):
            if cand <= cap and B % cand == 0:
                bb = cand
                break
    # v7x megacore: make the "parallel" batch axis >= 2 grid steps when the split
    # keeps the sublane (8) alignment of the block.
    if bb == B and B >= 16 and (B // 2) % 8 == 0:
        bb = B // 2
    return bb


def _weight_spec(shape):
    """Grid-invariant weight slab spec; single-buffer big slabs (v7x VMEM)."""
    nbytes = 2  # bf16
    for s in shape:
        nbytes *= int(s)
    if nbytes >= (2 << 20):
        return pl.BlockSpec(shape, lambda i: (0, 0), pipeline_mode=pl.Buffered(1))
    return pl.BlockSpec(shape, lambda i: (0, 0))


def kan_lstm_cell(x, h, c, w1x, w1h, w2x, w2h, vecs):
    """One KanLSTMCell step with pre-packed parameter slabs.

    w1x : ((G+1)*input_size, kan_hidden)  bf16  -- KAN_x layer-1 [spline rows | base rows]
    w1h : ((G+1)*hidden,     kan_hidden)  bf16  -- KAN_h layer-1
    w2x : ((G+1)*kan_hidden, hidden)      bf16  -- KAN_x layer-2
    w2h : ((G+1)*kan_hidden, hidden)      bf16  -- KAN_h layer-2
    vecs: (14, maxw) f32  rows:
        [x1.lnw/D, x1.lnb/D, h1.lnw/D, h1.lnb/D, x2.lnw/D, x2.lnb/D, h2.lnw/D, h2.lnb/D,
         x1.base_b, h1.base_b, x2.base_b + h2.base_b,
         grid_offsets(d_in)/D, grid_offsets(hidden)/D, grid_offsets(kan_hidden)/D]
    """
    B, d_in = x.shape
    hid = h.shape[1]
    kh = w1x.shape[1]
    assert w1x.shape[0] == (NUM_GRIDS + 1) * d_in
    assert w1h.shape[0] == (NUM_GRIDS + 1) * hid
    assert w2x.shape == ((NUM_GRIDS + 1) * kh, hid)
    assert w2h.shape == ((NUM_GRIDS + 1) * kh, hid)

    weight_bytes = 2 * (int(w1x.size) + int(w1h.size) + int(w2x.size) + int(w2h.size))
    weight_bytes += 4 * int(vecs.size)
    act_budget = max(4 * 1024 * 1024, _VMEM_LIMIT_BYTES // 3 - weight_bytes)
    bb = _pick_batch_tile(B, d_in, hid, kh, act_budget)
    grid = (B // bb,)

    # Lane-dense writeback: pad the fused [h|c] slab to 128 lanes when 2*hid < 128.
    out_w = 2 * hid if 2 * hid >= 128 else 128
    pad = out_w - 2 * hid

    kernel = _make_kernel(d_in, hid, kh, pad)

    out = pl.pallas_call(
        kernel,
        out_shape=jax.ShapeDtypeStruct((B, out_w), jnp.float32),
        grid=grid,
        in_specs=[
            pl.BlockSpec((bb, d_in), lambda i: (i, 0)),
            pl.BlockSpec((bb, hid), lambda i: (i, 0)),
            pl.BlockSpec((bb, hid), lambda i: (i, 0)),
            _weight_spec(w1x.shape),
            _weight_spec(w1h.shape),
            _weight_spec(w2x.shape),
            _weight_spec(w2h.shape),
            pl.BlockSpec(vecs.shape, lambda i: (0, 0)),
        ],
        out_specs=pl.BlockSpec((bb, out_w), lambda i: (i, 0)),
        compiler_params=pltpu.CompilerParams(
            dimension_semantics=("parallel",),
            vmem_limit_bytes=_VMEM_LIMIT_BYTES,
        ),
    )(x, h, c, w1x, w1h, w2x, w2h, vecs)
    return out[:, :hid], out[:, hid:2 * hid]


# ----------------------------------------------------------------------------
# Parameter construction / packing (wrapper-side, outside the kernel).
# ----------------------------------------------------------------------------
def make_kan_params(key, dims):
    """Deterministic per-layer FastKAN params for dims = [d0, d1, d2]."""
    layers = []
    for d_i, d_o in zip(dims[:-1], dims[1:]):
        key, k_sw, k_bw, k_bb = jax.random.split(key, 4)
        layers.append(dict(
            ln_w=jnp.ones((d_i,), jnp.float32),
            ln_b=jnp.zeros((d_i,), jnp.float32),
            # spline linear (no bias), trunc-normal init scale 0.1, per grid point
            sw=0.1 * jax.random.truncated_normal(
                k_sw, -2.0, 2.0, (NUM_GRIDS, d_i, d_o), jnp.float32),
            # base (SiLU path) linear with bias
            bw=jax.random.normal(k_bw, (d_i, d_o), jnp.float32) / jnp.sqrt(d_i),
            bb=0.01 * jax.random.normal(k_bb, (d_o,), jnp.float32),
        ))
    return key, layers


def pack_kan_lstm_params(x_layers, h_layers):
    """Pack ~20 small arrays into 4 bf16 weight slabs + 1 f32 vector slab."""
    def fused_w(layer):
        sw = layer["sw"]                        # (G, d_in, d_out), grid-major rows
        g, d_i, d_o = sw.shape
        return jnp.concatenate([sw.reshape(g * d_i, d_o), layer["bw"]], axis=0)

    w1x = fused_w(x_layers[0]).astype(jnp.bfloat16)
    w1h = fused_w(h_layers[0]).astype(jnp.bfloat16)
    w2x = fused_w(x_layers[1]).astype(jnp.bfloat16)
    w2h = fused_w(h_layers[1]).astype(jnp.bfloat16)

    grid_scaled = jnp.asarray(GRID_VALS, jnp.float32) * INV_DENOM     # (G,)

    def offsets(d):
        return jnp.repeat(grid_scaled, d)       # grid-major: [g0]*d, [g1]*d, ...

    d_in = x_layers[0]["ln_w"].shape[0]
    hid = h_layers[0]["ln_w"].shape[0]
    kh = x_layers[1]["ln_w"].shape[0]

    rows = [
        x_layers[0]["ln_w"] * INV_DENOM, x_layers[0]["ln_b"] * INV_DENOM,
        h_layers[0]["ln_w"] * INV_DENOM, h_layers[0]["ln_b"] * INV_DENOM,
        x_layers[1]["ln_w"] * INV_DENOM, x_layers[1]["ln_b"] * INV_DENOM,
        h_layers[1]["ln_w"] * INV_DENOM, h_layers[1]["ln_b"] * INV_DENOM,
        x_layers[0]["bb"], h_layers[0]["bb"],
        x_layers[1]["bb"] + h_layers[1]["bb"],
        offsets(d_in), offsets(hid), offsets(kh),
    ]
    maxw = max(int(r.shape[0]) for r in rows)
    vecs = jnp.stack([jnp.pad(r, (0, maxw - int(r.shape[0]))) for r in rows], axis=0)
    return w1x, w1h, w2x, w2h, vecs


# ----------------------------------------------------------------------------
# Pure-JAX reference (for correctness check only).
# ----------------------------------------------------------------------------
def _kan_layer_ref(z, layer):
    mean = jnp.mean(z, axis=-1, keepdims=True)
    var = jnp.mean((z - mean) ** 2, axis=-1, keepdims=True)
    zn = (z - mean) / jnp.sqrt(var + LN_EPS) * layer["ln_w"] + layer["ln_b"]
    grid = jnp.asarray(GRID_VALS, jnp.float32)
    rbf = jnp.exp(-(((zn[..., None] - grid) / DENOM) ** 2))           # (B, d_in, G)
    spline = jnp.einsum("bdg,gdo->bo", rbf, layer["sw"], precision="highest")
    base = jnp.dot(jax.nn.silu(z), layer["bw"], precision="highest") + layer["bb"]
    return spline + base


def kan_lstm_ref(x, h, c, x_layers, h_layers):
    kx = _kan_layer_ref(_kan_layer_ref(x, x_layers[0]), x_layers[1])
    kh = _kan_layer_ref(_kan_layer_ref(h, h_layers[0]), h_layers[1])
    z = kx + kh
    gate = jax.nn.sigmoid(z)
    c_tilde = jnp.tanh(z)
    c_next = gate * c + gate * c_tilde
    h_next = gate * jnp.tanh(c_next)
    return h_next, c_next


if __name__ == "__main__":
    B = 2
    INPUT_SIZE = 16
    HIDDEN_SIZE = 32
    KAN_HIDDEN_SIZE = 32

    key = jax.random.PRNGKey(0)
    key, k_x, k_h, k_c = jax.random.split(key, 4)
    x = jax.random.normal(k_x, (B, INPUT_SIZE), jnp.float32)
    h = jax.random.normal(k_h, (B, HIDDEN_SIZE), jnp.float32)
    c = jax.random.normal(k_c, (B, HIDDEN_SIZE), jnp.float32)

    # KAN_x: [input, kan_hidden, hidden]; KAN_h: [hidden, kan_hidden, hidden]
    key, x_layers = make_kan_params(key, [INPUT_SIZE, KAN_HIDDEN_SIZE, HIDDEN_SIZE])
    key, h_layers = make_kan_params(key, [HIDDEN_SIZE, KAN_HIDDEN_SIZE, HIDDEN_SIZE])
    # NOTE: b_i/b_f/b_o/b_c from __init__ are unused in the reference forward; omitted.

    w1x, w1h, w2x, w2h, vecs = pack_kan_lstm_params(x_layers, h_layers)

    h_next, c_next = kan_lstm_cell(x, h, c, w1x, w1h, w2x, w2h, vecs)
    jax.block_until_ready((h_next, c_next))

    assert h_next.shape == (B, HIDDEN_SIZE) and c_next.shape == (B, HIDDEN_SIZE)
    h_ref, c_ref = kan_lstm_ref(x, h, c, x_layers, h_layers)
    # Tolerance accounts for bf16 MXU inputs (f32 accumulate) + approx reciprocals.
    assert jnp.allclose(h_next, h_ref, atol=5e-2, rtol=5e-2)
    assert jnp.allclose(c_next, c_ref, atol=5e-2, rtol=5e-2)
    print("KERNEL_OK")
</pallas_src>

<mosaic_0001>
module attributes {stable_mosaic.version = 11 : i64} {
  func.func @kernel(%arg0: i32, %arg1: memref<2x16xf32, #tpu.memory_space<vmem>>, %arg2: memref<2x32xf32, #tpu.memory_space<vmem>>, %arg3: memref<2x32xf32, #tpu.memory_space<vmem>>, %arg4: memref<96x32xbf16, #tpu.memory_space<vmem>>, %arg5: memref<192x32xbf16, #tpu.memory_space<vmem>>, %arg6: memref<192x32xbf16, #tpu.memory_space<vmem>>, %arg7: memref<192x32xbf16, #tpu.memory_space<vmem>>, %arg8: memref<14x160xf32, #tpu.memory_space<vmem>>, %arg9: memref<2x128xf32, #tpu.memory_space<vmem>>) attributes {dimension_semantics = [#tpu.dimension_semantics<parallel>], iteration_bounds = array<i64: 1>, scalar_prefetch = 0 : i64, scratch_operands = 0 : i64, tpu.core_type = #tpu.core_type<tc>, window_params = [{transform_indices = @transform_0, window_bounds = array<i64: 2, 16>}, {transform_indices = @transform_1, window_bounds = array<i64: 2, 32>}, {transform_indices = @transform_2, window_bounds = array<i64: 2, 32>}, {pipeline_mode = #tpu.pipeline_mode<synchronous>, transform_indices = @transform_3, window_bounds = array<i64: 96, 32>}, {pipeline_mode = #tpu.pipeline_mode<synchronous>, transform_indices = @transform_4, window_bounds = array<i64: 192, 32>}, {pipeline_mode = #tpu.pipeline_mode<synchronous>, transform_indices = @transform_5, window_bounds = array<i64: 192, 32>}, {pipeline_mode = #tpu.pipeline_mode<synchronous>, transform_indices = @transform_6, window_bounds = array<i64: 192, 32>}, {pipeline_mode = #tpu.pipeline_mode<synchronous>, transform_indices = @transform_7, window_bounds = array<i64: 14, 160>}, {transform_indices = @transform_8, window_bounds = array<i64: 2, 128>}]} {
    %c0 = arith.constant 0 : index
    %c0_0 = arith.constant 0 : index
    %0 = vector.load %arg1[%c0, %c0_0] : memref<2x16xf32, #tpu.memory_space<vmem>>, vector<2x16xf32>
    %c0_1 = arith.constant 0 : index
    %c0_2 = arith.constant 0 : index
    %1 = vector.load %arg2[%c0_1, %c0_2] : memref<2x32xf32, #tpu.memory_space<vmem>>, vector<2x32xf32>
    %c0_3 = arith.constant 0 : index
    %c0_4 = arith.constant 0 : index
    %2 = vector.load %arg3[%c0_3, %c0_4] : memref<2x32xf32, #tpu.memory_space<vmem>>, vector<2x32xf32>
    %c0_5 = arith.constant 0 : index
    %c0_6 = arith.constant 0 : index
    %3 = vector.load %arg8[%c0_5, %c0_6] : memref<14x160xf32, #tpu.memory_space<vmem>>, vector<14x160xf32>
    %4 = vector.extract_strided_slice %3 {offsets = [0, 0], sizes = [1, 16], strides = [1, 1]} : vector<14x160xf32> to vector<1x16xf32>
    %5 = vector.extract_strided_slice %3 {offsets = [1, 0], sizes = [1, 16], strides = [1, 1]} : vector<14x160xf32> to vector<1x16xf32>
    %6 = vector.extract_strided_slice %3 {offsets = [11, 0], sizes = [1, 80], strides = [1, 1]} : vector<14x160xf32> to vector<1x80xf32>
    %cst = arith.constant dense<0.000000e+00> : vector<2xf32>
    %7 = vector.multi_reduction <add>, %0, %cst [1] : vector<2x16xf32> to vector<2xf32>
    %8 = vector.shape_cast %7 : vector<2xf32> to vector<2x1xf32>
    %cst_7 = arith.constant 1.600000e+01 : f32
    %9 = vector.broadcast %cst_7 : f32 to vector<2x1xf32>
    %10 = arith.divf %8, %9 : vector<2x1xf32>
    %11 = arith.mulf %0, %0 : vector<2x16xf32>
    %cst_8 = arith.constant dense<0.000000e+00> : vector<2xf32>
    %12 = vector.multi_reduction <add>, %11, %cst_8 [1] : vector<2x16xf32> to vector<2xf32>
    %13 = vector.shape_cast %12 : vector<2xf32> to vector<2x1xf32>
    %cst_9 = arith.constant 1.600000e+01 : f32
    %14 = vector.broadcast %cst_9 : f32 to vector<2x1xf32>
    %15 = arith.divf %13, %14 : vector<2x1xf32>
    %16 = arith.mulf %10, %10 : vector<2x1xf32>
    %17 = arith.subf %15, %16 : vector<2x1xf32>
    %cst_10 = arith.constant 0.000000e+00 : f32
    %18 = vector.broadcast %cst_10 : f32 to vector<2x1xf32>
    %19 = arith.maximumf %17, %18 : vector<2x1xf32>
    %20 = vector.broadcast %10 : vector<2x1xf32> to vector<2x16xf32>
    %21 = arith.subf %0, %20 : vector<2x16xf32>
    %cst_11 = arith.constant 9.99999974E-6 : f32
    %22 = vector.broadcast %cst_11 : f32 to vector<2x1xf32>
    %23 = arith.addf %19, %22 : vector<2x1xf32>
    %24 = math.rsqrt %23 : vector<2x1xf32>
    %25 = vector.broadcast %24 : vector<2x1xf32> to vector<2x16xf32>
    %26 = arith.mulf %21, %25 : vector<2x16xf32>
    %27 = vector.broadcast %4 : vector<1x16xf32> to vector<2x16xf32>
    %28 = arith.mulf %26, %27 : vector<2x16xf32>
    %29 = vector.broadcast %5 : vector<1x16xf32> to vector<2x16xf32>
    %30 = arith.addf %28, %29 : vector<2x16xf32>
    %31 = tpu.concatenate %30, %30, %30, %30, %30 in 1 : vector<2x16xf32>, vector<2x16xf32>, vector<2x16xf32>, vector<2x16xf32>, vector<2x16xf32> -> vector<2x80xf32>
    %32 = vector.broadcast %6 : vector<1x80xf32> to vector<2x80xf32>
    %33 = arith.subf %31, %32 : vector<2x80xf32>
    %34 = arith.mulf %33, %33 : vector<2x80xf32>
    %cst_12 = arith.constant 0.000000e+00 : f32
    %35 = vector.broadcast %cst_12 : f32 to vector<2x80xf32>
    %36 = arith.subf %35, %34 : vector<2x80xf32>
    %37 = math.exp %36 : vector<2x80xf32>
    %cst_13 = arith.constant -3.000000e+01 : f32
    %cst_14 = arith.constant 3.000000e+01 : f32
    %38 = vector.broadcast %cst_13 : f32 to vector<2x16xf32>
    %39 = arith.maximumf %38, %0 : vector<2x16xf32>
    %40 = vector.broadcast %cst_14 : f32 to vector<2x16xf32>
    %41 = arith.minimumf %40, %39 : vector<2x16xf32>
    %cst_15 = arith.constant 0.000000e+00 : f32
    %42 = vector.broadcast %cst_15 : f32 to vector<2x16xf32>
    %43 = arith.subf %42, %41 : vector<2x16xf32>
    %44 = math.exp %43 : vector<2x16xf32>
    %cst_16 = arith.constant 1.000000e+00 : f32
    %45 = vector.broadcast %cst_16 : f32 to vector<2x16xf32>
    %46 = arith.addf %45, %44 : vector<2x16xf32>
    %47 = tpu.reciprocal %46 {approx = true} : vector<2x16xf32> -> vector<2x16xf32>
    %48 = arith.mulf %0, %47 : vector<2x16xf32>
    %49 = tpu.concatenate %37, %48 in 1 : vector<2x80xf32>, vector<2x16xf32> -> vector<2x96xf32>
    %50 = arith.truncf %49 : vector<2x96xf32> to vector<2x96xbf16>
    %c0_17 = arith.constant 0 : index
    %c0_18 = arith.constant 0 : index
    %51 = vector.load %arg4[%c0_17, %c0_18] : memref<96x32xbf16, #tpu.memory_space<vmem>>, vector<96x32xbf16>
    %cst_19 = arith.constant dense<0.000000e+00> : vector<2x32xf32>
    %52 = tpu.matmul %50, %51, %cst_19 {dimension_numbers = #tpu.dot_dimension_numbers<[1], [0], [0], [1], [0, 0, 1, 1], [], []>} : vector<2x96xbf16>, vector<96x32xbf16>, vector<2x32xf32> -> vector<2x32xf32>
    %53 = vector.extract_strided_slice %3 {offsets = [8, 0], sizes = [1, 32], strides = [1, 1]} : vector<14x160xf32> to vector<1x32xf32>
    %54 = vector.broadcast %53 : vector<1x32xf32> to vector<2x32xf32>
    %55 = arith.addf %52, %54 : vector<2x32xf32>
    %56 = vector.extract_strided_slice %3 {offsets = [2, 0], sizes = [1, 32], strides = [1, 1]} : vector<14x160xf32> to vector<1x32xf32>
    %57 = vector.extract_strided_slice %3 {offsets = [3, 0], sizes = [1, 32], strides = [1, 1]} : vector<14x160xf32> to vector<1x32xf32>
    %58 = vector.extract_strided_slice %3 {offsets = [12, 0], sizes = [1, 160], strides = [1, 1]} : vector<14x160xf32> to vector<1x160xf32>
    %cst_20 = arith.constant dense<0.000000e+00> : vector<2xf32>
    %59 = vector.multi_reduction <add>, %1, %cst_20 [1] : vector<2x32xf32> to vector<2xf32>
    %60 = vector.shape_cast %59 : vector<2xf32> to vector<2x1xf32>
    %cst_21 = arith.constant 3.200000e+01 : f32
    %61 = vector.broadcast %cst_21 : f32 to vector<2x1xf32>
    %62 = arith.divf %60, %61 : vector<2x1xf32>
    %63 = arith.mulf %1, %1 : vector<2x32xf32>
    %cst_22 = arith.constant dense<0.000000e+00> : vector<2xf32>
    %64 = vector.multi_reduction <add>, %63, %cst_22 [1] : vector<2x32xf32> to vector<2xf32>
    %65 = vector.shape_cast %64 : vector<2xf32> to vector<2x1xf32>
    %cst_23 = arith.constant 3.200000e+01 : f32
    %66 = vector.broadcast %cst_23 : f32 to vector<2x1xf32>
    %67 = arith.divf %65, %66 : vector<2x1xf32>
    %68 = arith.mulf %62, %62 : vector<2x1xf32>
    %69 = arith.subf %67, %68 : vector<2x1xf32>
    %cst_24 = arith.constant 0.000000e+00 : f32
    %70 = vector.broadcast %cst_24 : f32 to vector<2x1xf32>
    %71 = arith.maximumf %69, %70 : vector<2x1xf32>
    %72 = vector.broadcast %62 : vector<2x1xf32> to vector<2x32xf32>
    %73 = arith.subf %1, %72 : vector<2x32xf32>
    %cst_25 = arith.constant 9.99999974E-6 : f32
    %74 = vector.broadcast %cst_25 : f32 to vector<2x1xf32>
    %75 = arith.addf %71, %74 : vector<2x1xf32>
    %76 = math.rsqrt %75 : vector<2x1xf32>
    %77 = vector.broadcast %76 : vector<2x1xf32> to vector<2x32xf32>
    %78 = arith.mulf %73, %77 : vector<2x32xf32>
    %79 = vector.broadcast %56 : vector<1x32xf32> to vector<2x32xf32>
    %80 = arith.mulf %78, %79 : vector<2x32xf32>
    %81 = vector.broadcast %57 : vector<1x32xf32> to vector<2x32xf32>
    %82 = arith.addf %80, %81 : vector<2x32xf32>
    %83 = tpu.concatenate %82, %82, %82, %82, %82 in 1 : vector<2x32xf32>, vector<2x32xf32>, vector<2x32xf32>, vector<2x32xf32>, vector<2x32xf32> -> vector<2x160xf32>
    %84 = vector.broadcast %58 : vector<1x160xf32> to vector<2x160xf32>
    %85 = arith.subf %83, %84 : vector<2x160xf32>
    %86 = arith.mulf %85, %85 : vector<2x160xf32>
    %cst_26 = arith.constant 0.000000e+00 : f32
    %87 = vector.broadcast %cst_26 : f32 to vector<2x160xf32>
    %88 = arith.subf %87, %86 : vector<2x160xf32>
    %89 = math.exp %88 : vector<2x160xf32>
    %cst_27 = arith.constant -3.000000e+01 : f32
    %cst_28 = arith.constant 3.000000e+01 : f32
    %90 = vector.broadcast %cst_27 : f32 to vector<2x32xf32>
    %91 = arith.maximumf %90, %1 : vector<2x32xf32>
    %92 = vector.broadcast %cst_28 : f32 to vector<2x32xf32>
    %93 = arith.minimumf %92, %91 : vector<2x32xf32>
    %cst_29 = arith.constant 0.000000e+00 : f32
    %94 = vector.broadcast %cst_29 : f32 to vector<2x32xf32>
    %95 = arith.subf %94, %93 : vector<2x32xf32>
    %96 = math.exp %95 : vector<2x32xf32>
    %cst_30 = arith.constant 1.000000e+00 : f32
    %97 = vector.broadcast %cst_30 : f32 to vector<2x32xf32>
    %98 = arith.addf %97, %96 : vector<2x32xf32>
    %99 = tpu.reciprocal %98 {approx = true} : vector<2x32xf32> -> vector<2x32xf32>
    %100 = arith.mulf %1, %99 : vector<2x32xf32>
    %101 = tpu.concatenate %89, %100 in 1 : vector<2x160xf32>, vector<2x32xf32> -> vector<2x192xf32>
    %102 = arith.truncf %101 : vector<2x192xf32> to vector<2x192xbf16>
    %c0_31 = arith.constant 0 : index
    %c0_32 = arith.constant 0 : index
    %103 = vector.load %arg5[%c0_31, %c0_32] : memref<192x32xbf16, #tpu.memory_space<vmem>>, vector<192x32xbf16>
    %cst_33 = arith.constant dense<0.000000e+00> : vector<2x32xf32>
    %104 = tpu.matmul %102, %103, %cst_33 {dimension_numbers = #tpu.dot_dimension_numbers<[1], [0], [0], [1], [0, 0, 1, 1], [], []>} : vector<2x192xbf16>, vector<192x32xbf16>, vector<2x32xf32> -> vector<2x32xf32>
    %105 = vector.extract_strided_slice %3 {offsets = [9, 0], sizes = [1, 32], strides = [1, 1]} : vector<14x160xf32> to vector<1x32xf32>
    %106 = vector.broadcast %105 : vector<1x32xf32> to vector<2x32xf32>
    %107 = arith.addf %104, %106 : vector<2x32xf32>
    %108 = vector.extract_strided_slice %3 {offsets = [4, 0], sizes = [1, 32], strides = [1, 1]} : vector<14x160xf32> to vector<1x32xf32>
    %109 = vector.extract_strided_slice %3 {offsets = [5, 0], sizes = [1, 32], strides = [1, 1]} : vector<14x160xf32> to vector<1x32xf32>
    %110 = vector.extract_strided_slice %3 {offsets = [13, 0], sizes = [1, 160], strides = [1, 1]} : vector<14x160xf32> to vector<1x160xf32>
    %cst_34 = arith.constant dense<0.000000e+00> : vector<2xf32>
    %111 = vector.multi_reduction <add>, %55, %cst_34 [1] : vector<2x32xf32> to vector<2xf32>
    %112 = vector.shape_cast %111 : vector<2xf32> to vector<2x1xf32>
    %cst_35 = arith.constant 3.200000e+01 : f32
    %113 = vector.broadcast %cst_35 : f32 to vector<2x1xf32>
    %114 = arith.divf %112, %113 : vector<2x1xf32>
    %115 = arith.mulf %55, %55 : vector<2x32xf32>
    %cst_36 = arith.constant dense<0.000000e+00> : vector<2xf32>
    %116 = vector.multi_reduction <add>, %115, %cst_36 [1] : vector<2x32xf32> to vector<2xf32>
    %117 = vector.shape_cast %116 : vector<2xf32> to vector<2x1xf32>
    %cst_37 = arith.constant 3.200000e+01 : f32
    %118 = vector.broadcast %cst_37 : f32 to vector<2x1xf32>
    %119 = arith.divf %117, %118 : vector<2x1xf32>
    %120 = arith.mulf %114, %114 : vector<2x1xf32>
    %121 = arith.subf %119, %120 : vector<2x1xf32>
    %cst_38 = arith.constant 0.000000e+00 : f32
    %122 = vector.broadcast %cst_38 : f32 to vector<2x1xf32>
    %123 = arith.maximumf %121, %122 : vector<2x1xf32>
    %124 = vector.broadcast %114 : vector<2x1xf32> to vector<2x32xf32>
    %125 = arith.subf %55, %124 : vector<2x32xf32>
    %cst_39 = arith.constant 9.99999974E-6 : f32
    %126 = vector.broadcast %cst_39 : f32 to vector<2x1xf32>
    %127 = arith.addf %123, %126 : vector<2x1xf32>
    %128 = math.rsqrt %127 : vector<2x1xf32>
    %129 = vector.broadcast %128 : vector<2x1xf32> to vector<2x32xf32>
    %130 = arith.mulf %125, %129 : vector<2x32xf32>
    %131 = vector.broadcast %108 : vector<1x32xf32> to vector<2x32xf32>
    %132 = arith.mulf %130, %131 : vector<2x32xf32>
    %133 = vector.broadcast %109 : vector<1x32xf32> to vector<2x32xf32>
    %134 = arith.addf %132, %133 : vector<2x32xf32>
    %135 = tpu.concatenate %134, %134, %134, %134, %134 in 1 : vector<2x32xf32>, vector<2x32xf32>, vector<2x32xf32>, vector<2x32xf32>, vector<2x32xf32> -> vector<2x160xf32>
    %136 = vector.broadcast %110 : vector<1x160xf32> to vector<2x160xf32>
    %137 = arith.subf %135, %136 : vector<2x160xf32>
    %138 = arith.mulf %137, %137 : vector<2x160xf32>
    %cst_40 = arith.constant 0.000000e+00 : f32
    %139 = vector.broadcast %cst_40 : f32 to vector<2x160xf32>
    %140 = arith.subf %139, %138 : vector<2x160xf32>
    %141 = math.exp %140 : vector<2x160xf32>
    %cst_41 = arith.constant -3.000000e+01 : f32
    %cst_42 = arith.constant 3.000000e+01 : f32
    %142 = vector.broadcast %cst_41 : f32 to vector<2x32xf32>
    %143 = arith.maximumf %142, %55 : vector<2x32xf32>
    %144 = vector.broadcast %cst_42 : f32 to vector<2x32xf32>
    %145 = arith.minimumf %144, %143 : vector<2x32xf32>
    %cst_43 = arith.constant 0.000000e+00 : f32
    %146 = vector.broadcast %cst_43 : f32 to vector<2x32xf32>
    %147 = arith.subf %146, %145 : vector<2x32xf32>
    %148 = math.exp %147 : vector<2x32xf32>
    %cst_44 = arith.constant 1.000000e+00 : f32
    %149 = vector.broadcast %cst_44 : f32 to vector<2x32xf32>
    %150 = arith.addf %149, %148 : vector<2x32xf32>
    %151 = tpu.reciprocal %150 {approx = true} : vector<2x32xf32> -> vector<2x32xf32>
    %152 = arith.mulf %55, %151 : vector<2x32xf32>
    %153 = tpu.concatenate %141, %152 in 1 : vector<2x160xf32>, vector<2x32xf32> -> vector<2x192xf32>
    %154 = vector.extract_strided_slice %3 {offsets = [6, 0], sizes = [1, 32], strides = [1, 1]} : vector<14x160xf32> to vector<1x32xf32>
    %155 = vector.extract_strided_slice %3 {offsets = [7, 0], sizes = [1, 32], strides = [1, 1]} : vector<14x160xf32> to vector<1x32xf32>
    %156 = vector.extract_strided_slice %3 {offsets = [13, 0], sizes = [1, 160], strides = [1, 1]} : vector<14x160xf32> to vector<1x160xf32>
    %cst_45 = arith.constant dense<0.000000e+00> : vector<2xf32>
    %157 = vector.multi_reduction <add>, %107, %cst_45 [1] : vector<2x32xf32> to vector<2xf32>
    %158 = vector.shape_cast %157 : vector<2xf32> to vector<2x1xf32>
    %cst_46 = arith.constant 3.200000e+01 : f32
    %159 = vector.broadcast %cst_46 : f32 to vector<2x1xf32>
    %160 = arith.divf %158, %159 : vector<2x1xf32>
    %161 = arith.mulf %107, %107 : vector<2x32xf32>
    %cst_47 = arith.constant dense<0.000000e+00> : vector<2xf32>
    %162 = vector.multi_reduction <add>, %161, %cst_47 [1] : vector<2x32xf32> to vector<2xf32>
    %163 = vector.shape_cast %162 : vector<2xf32> to vector<2x1xf32>
    %cst_48 = arith.constant 3.200000e+01 : f32
    %164 = vector.broadcast %cst_48 : f32 to vector<2x1xf32>
    %165 = arith.divf %163, %164 : vector<2x1xf32>
    %166 = arith.mulf %160, %160 : vector<2x1xf32>
    %167 = arith.subf %165, %166 : vector<2x1xf32>
    %cst_49 = arith.constant 0.000000e+00 : f32
    %168 = vector.broadcast %cst_49 : f32 to vector<2x1xf32>
    %169 = arith.maximumf %167, %168 : vector<2x1xf32>
    %170 = vector.broadcast %160 : vector<2x1xf32> to vector<2x32xf32>
    %171 = arith.subf %107, %170 : vector<2x32xf32>
    %cst_50 = arith.constant 9.99999974E-6 : f32
    %172 = vector.broadcast %cst_50 : f32 to vector<2x1xf32>
    %173 = arith.addf %169, %172 : vector<2x1xf32>
    %174 = math.rsqrt %173 : vector<2x1xf32>
    %175 = vector.broadcast %174 : vector<2x1xf32> to vector<2x32xf32>
    %176 = arith.mulf %171, %175 : vector<2x32xf32>
    %177 = vector.broadcast %154 : vector<1x32xf32> to vector<2x32xf32>
    %178 = arith.mulf %176, %177 : vector<2x32xf32>
    %179 = vector.broadcast %155 : vector<1x32xf32> to vector<2x32xf32>
    %180 = arith.addf %178, %179 : vector<2x32xf32>
    %181 = tpu.concatenate %180, %180, %180, %180, %180 in 1 : vector<2x32xf32>, vector<2x32xf32>, vector<2x32xf32>, vector<2x32xf32>, vector<2x32xf32> -> vector<2x160xf32>
    %182 = vector.broadcast %156 : vector<1x160xf32> to vector<2x160xf32>
    %183 = arith.subf %181, %182 : vector<2x160xf32>
    %184 = arith.mulf %183, %183 : vector<2x160xf32>
    %cst_51 = arith.constant 0.000000e+00 : f32
    %185 = vector.broadcast %cst_51 : f32 to vector<2x160xf32>
    %186 = arith.subf %185, %184 : vector<2x160xf32>
    %187 = math.exp %186 : vector<2x160xf32>
    %cst_52 = arith.constant -3.000000e+01 : f32
    %cst_53 = arith.constant 3.000000e+01 : f32
    %188 = vector.broadcast %cst_52 : f32 to vector<2x32xf32>
    %189 = arith.maximumf %188, %107 : vector<2x32xf32>
    %190 = vector.broadcast %cst_53 : f32 to vector<2x32xf32>
    %191 = arith.minimumf %190, %189 : vector<2x32xf32>
    %cst_54 = arith.constant 0.000000e+00 : f32
    %192 = vector.broadcast %cst_54 : f32 to vector<2x32xf32>
    %193 = arith.subf %192, %191 : vector<2x32xf32>
    %194 = math.exp %193 : vector<2x32xf32>
    %cst_55 = arith.constant 1.000000e+00 : f32
    %195 = vector.broadcast %cst_55 : f32 to vector<2x32xf32>
    %196 = arith.addf %195, %194 : vector<2x32xf32>
    %197 = tpu.reciprocal %196 {approx = true} : vector<2x32xf32> -> vector<2x32xf32>
    %198 = arith.mulf %107, %197 : vector<2x32xf32>
    %199 = tpu.concatenate %187, %198 in 1 : vector<2x160xf32>, vector<2x32xf32> -> vector<2x192xf32>
    %200 = arith.truncf %153 : vector<2x192xf32> to vector<2x192xbf16>
    %c0_56 = arith.constant 0 : index
    %c0_57 = arith.constant 0 : index
    %201 = vector.load %arg6[%c0_56, %c0_57] : memref<192x32xbf16, #tpu.memory_space<vmem>>, vector<192x32xbf16>
    %cst_58 = arith.constant dense<0.000000e+00> : vector<2x32xf32>
    %202 = tpu.matmul %200, %201, %cst_58 {dimension_numbers = #tpu.dot_dimension_numbers<[1], [0], [0], [1], [0, 0, 1, 1], [], []>} : vector<2x192xbf16>, vector<192x32xbf16>, vector<2x32xf32> -> vector<2x32xf32>
    %203 = arith.truncf %199 : vector<2x192xf32> to vector<2x192xbf16>
    %c0_59 = arith.constant 0 : index
    %c0_60 = arith.constant 0 : index
    %204 = vector.load %arg7[%c0_59, %c0_60] : memref<192x32xbf16, #tpu.memory_space<vmem>>, vector<192x32xbf16>
    %cst_61 = arith.constant dense<0.000000e+00> : vector<2x32xf32>
    %205 = tpu.matmul %203, %204, %cst_61 {dimension_numbers = #tpu.dot_dimension_numbers<[1], [0], [0], [1], [0, 0, 1, 1], [], []>} : vector<2x192xbf16>, vector<192x32xbf16>, vector<2x32xf32> -> vector<2x32xf32>
    %206 = arith.addf %202, %205 : vector<2x32xf32>
    %207 = vector.extract_strided_slice %3 {offsets = [10, 0], sizes = [1, 32], strides = [1, 1]} : vector<14x160xf32> to vector<1x32xf32>
    %208 = vector.broadcast %207 : vector<1x32xf32> to vector<2x32xf32>
    %209 = arith.addf %206, %208 : vector<2x32xf32>
    %cst_62 = arith.constant -2.000000e+01 : f32
    %cst_63 = arith.constant 2.000000e+01 : f32
    %210 = vector.broadcast %cst_62 : f32 to vector<2x32xf32>
    %211 = arith.maximumf %210, %209 : vector<2x32xf32>
    %212 = vector.broadcast %cst_63 : f32 to vector<2x32xf32>
    %213 = arith.minimumf %212, %211 : vector<2x32xf32>
    %cst_64 = arith.constant 0.000000e+00 : f32
    %214 = vector.broadcast %cst_64 : f32 to vector<2x32xf32>
    %215 = arith.subf %214, %213 : vector<2x32xf32>
    %216 = math.exp %215 : vector<2x32xf32>
    %cst_65 = arith.constant 1.000000e+00 : f32
    %217 = vector.broadcast %cst_65 : f32 to vector<2x32xf32>
    %218 = arith.addf %217, %216 : vector<2x32xf32>
    %219 = tpu.reciprocal %218 {approx = true} : vector<2x32xf32> -> vector<2x32xf32>
    %220 = arith.mulf %216, %216 : vector<2x32xf32>
    %cst_66 = arith.constant 1.000000e+00 : f32
    %221 = vector.broadcast %cst_66 : f32 to vector<2x32xf32>
    %222 = arith.subf %221, %220 : vector<2x32xf32>
    %cst_67 = arith.constant 1.000000e+00 : f32
    %223 = vector.broadcast %cst_67 : f32 to vector<2x32xf32>
    %224 = arith.addf %223, %220 : vector<2x32xf32>
    %225 = tpu.reciprocal %224 {approx = true} : vector<2x32xf32> -> vector<2x32xf32>
    %226 = arith.mulf %222, %225 : vector<2x32xf32>
    %227 = arith.addf %2, %226 : vector<2x32xf32>
    %228 = arith.mulf %219, %227 : vector<2x32xf32>
    %cst_68 = arith.constant -2.000000e+01 : f32
    %cst_69 = arith.constant 2.000000e+01 : f32
    %229 = vector.broadcast %cst_68 : f32 to vector<2x32xf32>
    %230 = arith.maximumf %229, %228 : vector<2x32xf32>
    %231 = vector.broadcast %cst_69 : f32 to vector<2x32xf32>
    %232 = arith.minimumf %231, %230 : vector<2x32xf32>
    %cst_70 = arith.constant -2.000000e+00 : f32
    %233 = vector.broadcast %cst_70 : f32 to vector<2x32xf32>
    %234 = arith.mulf %233, %232 : vector<2x32xf32>
    %235 = math.exp %234 : vector<2x32xf32>
    %cst_71 = arith.constant 1.000000e+00 : f32
    %236 = vector.broadcast %cst_71 : f32 to vector<2x32xf32>
    %237 = arith.subf %236, %235 : vector<2x32xf32>
    %cst_72 = arith.constant 1.000000e+00 : f32
    %238 = vector.broadcast %cst_72 : f32 to vector<2x32xf32>
    %239 = arith.addf %238, %235 : vector<2x32xf32>
    %240 = tpu.reciprocal %239 {approx = true} : vector<2x32xf32> -> vector<2x32xf32>
    %241 = arith.mulf %237, %240 : vector<2x32xf32>
    %242 = arith.mulf %219, %241 : vector<2x32xf32>
    %cst_73 = arith.constant 0.000000e+00 : f32
    %243 = vector.broadcast %cst_73 : f32 to vector<2x64xf32>
    %244 = tpu.concatenate %242, %228, %243 in 1 : vector<2x32xf32>, vector<2x32xf32>, vector<2x64xf32> -> vector<2x128xf32>
    %c0_74 = arith.constant 0 : index
    %c0_75 = arith.constant 0 : index
    %245 = vector.load %arg9[%c0_74, %c0_75] : memref<2x128xf32, #tpu.memory_space<vmem>>, vector<2x128xf32>
    tpu.vector_store %arg9[%c0_74, %c0_75], %244 {strides = array<i32>} : memref<2x128xf32, #tpu.memory_space<vmem>>, vector<2x128xf32>,
    return
  }
  func.func @transform_0(%arg0: i32) -> (i32, i32) {
    %c0_i32 = arith.constant 0 : i32
    %c0_i32_0 = arith.constant 0 : i32
    return %arg0, %c0_i32 : i32, i32
  }
  func.func @transform_1(%arg0: i32) -> (i32, i32) {
    %c0_i32 = arith.constant 0 : i32
    %c0_i32_0 = arith.constant 0 : i32
    return %arg0, %c0_i32 : i32, i32
  }
  func.func @transform_2(%arg0: i32) -> (i32, i32) {
    %c0_i32 = arith.constant 0 : i32
    %c0_i32_0 = arith.constant 0 : i32
    return %arg0, %c0_i32 : i32, i32
  }
  func.func @transform_3(%arg0: i32) -> (i32, i32) {
    %c0_i32 = arith.constant 0 : i32
    %c0_i32_0 = arith.constant 0 : i32
    %c0_i32_1 = arith.constant 0 : i32
    return %c0_i32, %c0_i32_0 : i32, i32
  }
  func.func @transform_4(%arg0: i32) -> (i32, i32) {
    %c0_i32 = arith.constant 0 : i32
    %c0_i32_0 = arith.constant 0 : i32
    %c0_i32_1 = arith.constant 0 : i32
    return %c0_i32, %c0_i32_0 : i32, i32
  }
  func.func @transform_5(%arg0: i32) -> (i32, i32) {
    %c0_i32 = arith.constant 0 : i32
    %c0_i32_0 = arith.constant 0 : i32
    %c0_i32_1 = arith.constant 0 : i32
    return %c0_i32, %c0_i32_0 : i32, i32
  }
  func.func @transform_6(%arg0: i32) -> (i32, i32) {
    %c0_i32 = arith.constant 0 : i32
    %c0_i32_0 = arith.constant 0 : i32
    %c0_i32_1 = arith.constant 0 : i32
    return %c0_i32, %c0_i32_0 : i32, i32
  }
  func.func @transform_7(%arg0: i32) -> (i32, i32) {
    %c0_i32 = arith.constant 0 : i32
    %c0_i32_0 = arith.constant 0 : i32
    %c0_i32_1 = arith.constant 0 : i32
    return %c0_i32, %c0_i32_0 : i32, i32
  }
  func.func @transform_8(%arg0: i32) -> (i32, i32) {
    %c0_i32 = arith.constant 0 : i32
    %c0_i32_0 = arith.constant 0 : i32
    return %arg0, %c0_i32 : i32, i32
  }
}

</mosaic_0001>

<bundles_post_ra>
// kernel: tpu_custom_call.1
= control target key start
LH: loop header
LB: loop body
LE: loop exit
PB: predicated region body
PF: predicated region fallthrough
CT: control target
= control target key end

     0   :  { %vm182_vm0 = vcmask 254976   ;;  %vm37_vm1 = vcmask 123904   ;;  %s1459_s0 = inlined_call_operand.vmem [shape: f32[2,16], index: 0, kind: input, shape index: {}]   ;;  %s1460_s1 = inlined_call_operand.vmem [shape: f32[2,32], index: 1, kind: input, shape index: {}]   ;;  %s1461_s2 = inlined_call_operand.vmem [shape: f32[2,32], index: 2, kind: input, shape index: {}]   ;;  %s1462_s3 = inlined_call_operand.vmem [shape: bf16[96,32], index: 3, kind: input, shape index: {}]   ;;  %s1463_s4 = inlined_call_operand.vmem [shape: bf16[192,32], index: 4, kind: input, shape index: {}]   ;;  %s1464_s5 = inlined_call_operand.vmem [shape: bf16[192,32], index: 5, kind: input, shape index: {}]   ;;  %s1465_s6 = inlined_call_operand.vmem [shape: bf16[192,32], index: 6, kind: input, shape index: {}]   ;;  %s1466_s7 = inlined_call_operand.vmem [shape: f32[14,160], index: 7, kind: input, shape index: {}]   ;;  %s1467_s8 = inlined_call_operand.hbm [shape: f32[2,128], index: 8, kind: output, shape index: {}]  }
   0x1   :  { %v1184_v0 = vld [vmem:[%s1460_s1] sm:$0x3] }
   0x2   :  { %v1189_v1 = vld [vmem:[%s1459_s0] sm:$0x3]  ;;  %v183_v2 = vsel %vm182_vm0, %v1184_v0, 0.0 }
   0x3   :  { %v38_v3 = vsel %vm37_vm1, %v1189_v1, 0.0 }
   0x4   :  { %13 = vsyncpa [#allocation3], 0  ;;  %184 = vadd.xlane.f32.xlu0 %v183_v2  ;;  %39 = vadd.xlane.f32.xlu1 %v38_v3  ;;  %v194_v4 = vmul.f32 %v1184_v0, %v1184_v0  ;;  %v49_v5 = vmul.f32 %v1189_v1, %v1189_v1  ;;  %v1127_v8 = vmov 16.0   ;;  %v1128_v9 = vmov 32.0   ;;  %v1207_v51 = vld [vmem:[%s1466_s7] sm:$0xff]  ;;  %s1129_s9 = smov 96  }
   0x5   :  { %1049 = vrcp.f32 %v1127_v8  ;;  %v846_v32 = vclamps-f32 %v1184_v0, 30.0  ;;  %v215_v57 = vperm.slane %v1207_v51, 2  ;;  %v70_v60 = vperm.slane %v1207_v51, 0  ;;  %s1130_s10 = smov 32   ;;  %s1131_s11 = smov 16  }
   0x6   :  { %v195_v6 = vsel %vm182_vm0, %v194_v4, 0.0  ;;  %v50_v7 = vsel %vm37_vm1, %v49_v5, 0.0  ;;  %1051 = vrcp.f32 %v1128_v9  ;;  %v217_v63 = vperm.slane %v1207_v51, 3  ;;  %s1132_s12 = smov 64   ;;  %s1133_s13 = smov 48  }
   0x7   :  { %v246_v37 = vsub.f32 0.0, %v846_v32  ;;  %v72_v3 = vperm.slane %v1207_v51, 1  ;;  %v820_v9 = vclamps-f32 %v1189_v1, 30.0  ;;  %s1134_s14 = smov 80   ;;  %vm89_vm10 = vcmask 261120   ;;  %s1135_s30 = smov [#allocation2]  }
   0x8   :  { %vm93_vm11 = vcmask 523264   ;;  %vm165_vm12 = vcmask 785408   ;;  %vm87_vm13 = vcmask 130048   ;;  %vm91_vm14 = vcmask 392192   ;;  %s809_s0 = sshll.u32 %s1135_s30, 4  ;;  %s811_s1 = sshll.u32 %s1467_s8, 4  ;;  %s810_s0 = int_to_ptr.vmem [resolvable:$true] %s809_s0  ;;  %s812_s1 = int_to_ptr.hbm [resolvable:$true] %s811_s1 }
   0x9   :  { %v247_v40 = vmul.f32 1.442695, %v246_v37  ;;  %v999_v37 = vld [vmem:[%s1462_s3 + $0x8] sm:$0xff]  ;;  %vm113_vm15 = vcmask 654336  }
   0xb   :  { %v1050_v10 = vpop.eup %1049 }
   0xc   :  { %196 = vadd.xlane.f32.xlu0 %v195_v6  ;;  %51 = vadd.xlane.f32.xlu1 %v50_v7  ;;  %v1052_v11 = vpop.eup %1051  ;;  %v42_v12 = vmul.f32 16.0, %v1050_v10  ;;  %vm46_vm2 = vweird.f32 %v1050_v10 }
   0xd   :  { %v187_v13 = vmul.f32 32.0, %v1052_v11  ;;  %vm191_vm3 = vweird.f32 %v1052_v11 }
   0xe   :  { %v43_v14 = vsub.f32 1.0, %v42_v12 }
   0xf   :  { %v188_v15 = vsub.f32 1.0, %v187_v13 }
  0x10   :  { %v44_v16 = vmul.f32 %v1050_v10, %v43_v14 }
  0x11   :  { %v189_v17 = vmul.f32 %v1052_v11, %v188_v15 }
  0x12   :  { %v45_v18 = vadd.f32 %v1050_v10, %v44_v16  ;;  %v1011_v16 = vld [vmem:[%s1463_s4 + $0x38] sm:$0xff] }
  0x13   :  { %v190_v19 = vadd.f32 %v1052_v11, %v189_v17  ;;  %359 = vmatpush.bf16.msra.mxu1 %v1011_v16  ;;  %v1010_v17 = vld [vmem:[%s1463_s4 + $0x30] sm:$0xff] }
  0x14   :  { %v47_v21 = vsel %vm46_vm2, %v1050_v10, %v45_v18  ;;  %v1009_v18 = vld [vmem:[%s1463_s4 + $0x28] sm:$0xff] }
  0x15   :  { %v1199_v23 = vsel %vm191_vm3, %v1052_v11, %v190_v19  ;;  %v103_v11 = vsub.f32 0.0, %v820_v9  ;;  %v1008_v19 = vld [vmem:[%s1463_s4 + $0x20] sm:$0xff] }
  0x17   :  { %v104_v12 = vmul.f32 1.442695, %v103_v11  ;;  %360 = vmatpush.bf16.msra.mxu1 %v1010_v17 }
  0x1b   :  { %361 = vmatpush.bf16.msra.mxu1 %v1009_v18 }
  0x1f   :  { %362 = vmatpush.bf16.msra.mxu1 %v1008_v19 }
  0x77   :  { %v185_v20 = vpop.xlane.xlu0 %184  ;;  %v40_v22 = vpop.xlane.xlu1 %39 }
  0x78   :  { %v48_v24 = vmul.f32 %v47_v21, %v40_v22  ;;  %v193_v25 = vmul.f32 %v1199_v23, %v185_v20  ;;  %v1014_v20 = vld [vmem:[%s1463_s4 + $0x50] sm:$0xff]  ;;  %v1003_v22 = vld [vmem:[%s1462_s3 + $0x28] sm:$0xff] }
  0x79   :  { %171 = vmatpush.bf16.msra.mxu0 %v1003_v22 }
  0x7a   :  { %v54_v26 = vmul.f32 %v48_v24, %v48_v24  ;;  %v199_v29 = vmul.f32 %v193_v25, %v193_v25  ;;  %v202_v55 = vsub.f32 %v1184_v0, %v193_v25  ;;  %v57_v58 = vsub.f32 %v1189_v1, %v48_v24  ;;  %v1013_v24 = vld [vmem:[%s1463_s4 + $0x48] sm:$0xff]  ;;  %v1006_v25 = vld [vmem:[%s1463_s4 + $0x10] sm:$0xff] }
  0x7f   :  { %v197_v27 = vpop.xlane.xlu0 %196  ;;  %v52_v28 = vpop.xlane.xlu1 %51 }
  0x80   :  { %v198_v30 = vmul.f32 %v197_v27, %v1199_v23  ;;  %v53_v31 = vmul.f32 %v52_v28, %v47_v21  ;;  %v1007_v21 = vld [vmem:[%s1463_s4 + $0x18] sm:$0xff]  ;;  %v1002_v27 = vld [vmem:[%s1462_s3 + $0x20] sm:$0xff] }
  0x81   :  { %363 = vmatpush.bf16.msra.mxu1 %v1007_v21  ;;  %v1012_v28 = vld [vmem:[%s1463_s4 + $0x40] sm:$0xff]  ;;  %172 = vmatpush.bf16.msra.mxu0 %v1002_v27 }
  0x82   :  { %v200_v33 = vsub.f32 %v198_v30, %v199_v29  ;;  %v55_v34 = vsub.f32 %v53_v31, %v54_v26  ;;  %v1274_v29 = vld [vmem:[%s1466_s7 + $0x18] sm:$0x3f]  ;;  %v1005_v30 = vld [vmem:[%s1463_s4 + $0x8] sm:$0xff] }
  0x83   :  { %v1001_v31 = vld [vmem:[%s1462_s3 + $0x18] sm:$0xff]  ;;  %v233_v32 = vperm.slane %v1274_v29, 4 }
  0x84   :  { %v201_v35 = vmax.f32 %v200_v33, 0.0  ;;  %v56_v36 = vmax.f32 %v55_v34, 0.0  ;;  %v1004_v33 = vld [vmem:[%s1463_s4] sm:$0xff] }
  0x85   :  { %364 = vmatpush.bf16.msra.mxu1 %v1006_v25  ;;  %173 = vmatpush.bf16.msra.mxu0 %v1001_v31 }
  0x86   :  { %v203_v38 = vadd.f32 1e-05, %v201_v35  ;;  %v58_v39 = vadd.f32 1e-05, %v56_v36  ;;  %v1000_v35 = vld [vmem:[%s1462_s3 + $0x10] sm:$0xff] }
  0x88   :  { %1053 = vrsqrt.f32 %v203_v38  ;;  %vm210_vm6 = vweird.f32 %v203_v38  ;;  %vm65_vm8 = vweird.f32 %v58_v39 }
  0x89   :  { %1055 = vrsqrt.f32 %v58_v39  ;;  %365 = vmatpush.bf16.msra.mxu1 %v1005_v30  ;;  %174 = vmatpush.bf16.msra.mxu0 %v1000_v35 }
  0x8a   :  { %1057 = vpow2.f32 %v247_v40  ;;  %v998_v40 = vld [vmem:[%s1462_s3] sm:$0xff] }
  0x8d   :  { %366 = vmatpush.bf16.msra.mxu1 %v1004_v33  ;;  %175 = vmatpush.bf16.msra.mxu0 %v999_v37 }
  0x8e   :  { %v1054_v41 = vpop.eup %1053 }
  0x8f   :  { %v1056_v42 = vpop.eup %1055  ;;  %v205_v43 = vmul.f32 %v1054_v41, %v203_v38  ;;  %vm211_vm4 = vweird.f32 %v1054_v41 }
  0x90   :  { %v60_v44 = vmul.f32 %v1056_v42, %v58_v39  ;;  %v1058_v48 = vpop.eup %1057  ;;  %vm66_vm5 = vweird.f32 %v1056_v42  ;;  %vm212_vm7 = vmor %vm210_vm6, %vm211_vm4 }
  0x91   :  { %v206_v45 = vmul.f32 %v1054_v41, %v205_v43  ;;  %v249_v54 = vadd.f32 1.0, %v1058_v48  ;;  %vm67_vm9 = vmor %vm65_vm8, %vm66_vm5  ;;  %176 = vmatpush.bf16.msra.mxu0 %v998_v40 }
  0x92   :  { %v61_v46 = vmul.f32 %v1056_v42, %v60_v44 }
  0x93   :  { %v207_v47 = vmul.f32 0.5, %v206_v45  ;;  %1059 = vrcp.f32 %v249_v54 }
  0x94   :  { %v62_v49 = vmul.f32 0.5, %v61_v46  ;;  %1061 = vpow2.f32 %v104_v12 }
  0x95   :  { %v208_v50 = vsub.f32 1.5, %v207_v47 }
  0x96   :  { %v63_v52 = vsub.f32 1.5, %v62_v49 }
  0x97   :  { %v209_v53 = vmul.f32 %v1054_v41, %v208_v50 }
  0x98   :  { %v64_v56 = vmul.f32 %v1056_v42, %v63_v52 }
  0x99   :  { %v213_v59 = vsel %vm212_vm7, %v1054_v41, %v209_v53  ;;  %v1060_v8 = vpop.eup %1059 }
  0x9a   :  { %v214_v61 = vmul.f32 %v213_v59, %v202_v55  ;;  %v68_v62 = vsel %vm67_vm9, %v1056_v42, %v64_v56  ;;  %v251_v10 = vmul.f32 %v1060_v8, %v1184_v0  ;;  %v1062_v13 = vpop.eup %1061  ;;  %v1299_v42 = vld [vmem:[%s1466_s7 + $0x10] sm:$0x3f] }
  0x9b   :  { %v69_v2 = vmul.f32 %v68_v62, %v57_v58  ;;  %v106_v14 = vadd.f32 1.0, %v1062_v13  ;;  %v232_v43 = vperm.slane %v1299_v42, 4  ;;  %v128_v19 = vperm.slane %v1299_v42, 0 }
  0x9c   :  { %v216_v4 = vmul.f32 %v215_v57, %v214_v61  ;;  %v95_v57 = vperm.slane %v1299_v42, 3 }
  0x9d   :  { %v71_v5 = vmul.f32 %v70_v60, %v69_v2  ;;  %1063 = vrcp.f32 %v106_v14  ;;  %v283_v14 = vperm.slane %v1299_v42, 1 }
  0x9e   :  { %v1215_v6 = vadd.f32 %v217_v63, %v216_v4 }
  0x9f   :  { %v1217_v7 = vadd.f32 %v72_v3, %v71_v5 }
  0xa0   :  { %226 = vrot.lane.b32.xlu0 %v1215_v6, %s1129_s9  ;;  %220 = vrot.lane.b32.xlu2 %v1215_v6, %s1130_s10  ;;  %v235_v36 = vsub.f32 %v1215_v6, %v233_v32 }
  0xa1   :  { %75 = vrot.lane.b32.xlu1 %v1217_v7, %s1131_s11 }
  0xa2   :  { %v237_v38 = vmul.f32 %v235_v36, %v235_v36 }
  0xa3   :  { %v1064_v0 = vpop.eup %1063 }
  0xa4   :  { %v108_v15 = vmul.f32 %v1064_v0, %v1189_v1  ;;  %v1015_v1 = vld [vmem:[%s1463_s4 + $0x58] sm:$0xff]  ;;  %v239_v41 = vsub.f32 0.0, %v237_v38 }
  0xa5   :  { %376 = vmatpush.bf16.msra.mxu2 %v1015_v1 }
  0xa6   :  { %v242_v44 = vmul.f32 1.442695, %v239_v41 }
  0xa8   :  { %253 = vrot.lane.b32.xlu0 %v251_v10, %s1130_s10  ;;  %223 = vrot.lane.b32.xlu2 %v1215_v6, %s1132_s12  ;;  %1065 = vpow2.f32 %v242_v44 }
  0xa9   :  { %377 = vmatpush.bf16.msra.mxu2 %v1014_v20 }
  0xad   :  { %378 = vmatpush.bf16.msra.mxu2 %v1013_v24 }
  0xae   :  { %v1066_v58 = vpop.eup %1065 }
  0xb0   :  { %78 = vrot.lane.b32.xlu2 %v1217_v7, %s1130_s10 }
  0xb1   :  { %379 = vmatpush.bf16.msra.mxu2 %v1012_v28 }
  0xb8   :  { %81 = vrot.lane.b32.xlu2 %v1217_v7, %s1133_s13 }
  0xc0   :  { %84 = vrot.lane.b32.xlu2 %v1217_v7, %s1132_s12 }
  0xc8   :  { %110 = vrot.lane.b32.xlu2 %v108_v15, %s1134_s14 }
  0xfa   :  { %v221_v26 = vpop.permute.xlu2 %220 }
  0xfb   :  { %v229_v45 = vsel %vm89_vm10, %v1215_v6, %v221_v26 }
 0x102   :  { %v224_v34 = vpop.permute.xlu2 %223 }
 0x103   :  { %v230_v46 = vsel %vm93_vm11, %v229_v45, %v224_v34 }
 0x10a   :  { %v79_v39 = vpop.permute.xlu2 %78 }
 0x112   :  { %v227_v47 = vpop.permute.xlu0 %226  ;;  %v82_v48 = vpop.permute.xlu2 %81 }
 0x113   :  { %v231_v49 = vsel %vm165_vm12, %v230_v46, %v227_v47  ;;  %v76_v50 = vpop.permute.xlu1 %75 }
 0x114   :  { %v234_v52 = vsub.f32 %v231_v49, %v232_v43  ;;  %v88_v53 = vsel %vm87_vm13, %v1217_v7, %v76_v50 }
 0x115   :  { %v90_v55 = vsel %vm89_vm10, %v88_v53, %v79_v39 }
 0x116   :  { %v236_v54 = vmul.f32 %v234_v52, %v234_v52  ;;  %v92_v61 = vsel %vm91_vm14, %v90_v55, %v82_v48 }
 0x118   :  { %v238_v56 = vsub.f32 0.0, %v236_v54 }
 0x11a   :  { %v254_v59 = vpop.permute.xlu0 %253  ;;  %v85_v60 = vpop.permute.xlu2 %84  ;;  %v240_v62 = vmul.f32 1.442695, %v238_v56 }
 0x11b   :  { %v256_v63 = vsel %vm89_vm10, %v1066_v58, %v254_v59  ;;  %v94_v2 = vsel %vm93_vm11, %v92_v61, %v85_v60 }
 0x11c   :  { %v258_v3 = vpack.c.bf16 %v256_v63, %v256_v63  ;;  %v96_v4 = vsub.f32 %v94_v2, %v95_v57  ;;  %1067 = vpow2.f32 %v240_v62 }
 0x11e   :  { %v97_v5 = vmul.f32 %v96_v4, %v96_v4  ;;  %895 = vmatmul.msk.bf16.vlgmr.msra.gmra.mxu2 %vm93_vm11, %v258_v3  ;;  %v477_v3 = vperm.slane %v1207_v51, 6 }
 0x120   :  { %v98_v6 = vsub.f32 0.0, %v97_v5 }
 0x122   :  { %v1068_v7 = vpop.eup %1067  ;;  %v99_v8 = vmul.f32 1.442695, %v98_v6  ;;  %v111_v10 = vpop.permute.xlu2 %110 }
 0x123   :  { %v257_v9 = vpack.c.bf16 %v1068_v7, %v1068_v7 }
 0x124   :  { %1069 = vpow2.f32 %v99_v8  ;;  %v479_v8 = vperm.slane %v1207_v51, 7 }
 0x125   :  { %367 = vmatmul.bf16.vlgmr.msra.gmra.mxu1 %v257_v9 }
 0x12a   :  { %v1070_v11 = vpop.eup %1069 }
 0x12b   :  { %v114_v12 = vsel %vm113_vm15, %v1070_v11, %v111_v10 }
 0x12c   :  { %v115_v13 = vpack.c.bf16 %v114_v12, %v114_v12 }
 0x12e   :  { %845 = vmatmul.msk.bf16.vlgmr.msra.gmra.mxu0 %vm165_vm12, %v115_v13 }
 0x1a1   :  { %v381_v0 = vpop.f32.mrf.mxu2 }
 0x1a2   :  { %v368_v15 = vpop.f32.mrf.mxu1 }
 0x1a3   :  { %v369_v16 = vadd.f32 %v368_v15, %v283_v14 }
 0x1a5   :  { %v1314_v17 = vadd.f32 %v381_v0, %v369_v16  ;;  %v410_v0 = vperm.slane %v1207_v51, 4 }
 0x1a7   :  { %v452_v18 = vsel %vm182_vm0, %v1314_v17, 0.0  ;;  %v456_v1 = vmul.f32 %v1314_v17, %v1314_v17  ;;  %v897_v39 = vclamps-f32 %v1314_v17, 30.0 }
 0x1a8   :  { %453 = vadd.xlane.f32.xlu1 %v452_v18  ;;  %v412_v18 = vperm.slane %v1207_v51, 5  ;;  %v1027_v51 = vld [vmem:[%s1464_s5 + $0x58] sm:$0xff] }
 0x1a9   :  { %v383_v20 = vpop.f32.mrf.mxu2  ;;  %v457_v21 = vsel %vm182_vm0, %v456_v1, 0.0  ;;  %v506_v46 = vsub.f32 0.0, %v897_v39  ;;  %762 = vmatpush.bf16.msrb.mxu1 %v1027_v51 }
 0x1aa   :  { %v370_v22 = vpop.f32.mrf.mxu1  ;;  %458 = vadd.xlane.f32.xlu0 %v457_v21 }
 0x1ab   :  { %v178_v24 = vpop.f32.mrf.mxu0  ;;  %v507_v50 = vmul.f32 1.442695, %v506_v46  ;;  %v1021_v46 = vld [vmem:[%s1464_s5 + $0x28] sm:$0xff] }
 0x1ac   :  { %v1322_v25 = vadd.f32 %v178_v24, %v128_v19 }
 0x1ae   :  { %v385_v26 = vsel %vm182_vm0, %v1322_v25, 0.0  ;;  %v389_v27 = vmul.f32 %v1322_v25, %v1322_v25  ;;  %v896_v49 = vclamps-f32 %v1322_v25, 30.0 }
 0x1af   :  { %386 = vadd.xlane.f32.xlu2 %v385_v26 }
 0x1b0   :  { %v390_v28 = vsel %vm182_vm0, %v389_v27, 0.0  ;;  %v441_v55 = vsub.f32 0.0, %v896_v49  ;;  %v1035_v27 = vld [vmem:[%s1465_s6 + $0x38] sm:$0xff] }
 0x1b1   :  { %391 = vadd.xlane.f32.xlu1 %v390_v28  ;;  %644 = vmatpush.bf16.msra.mxu3 %v1035_v27  ;;  %v1024_v28 = vld [vmem:[%s1464_s5 + $0x40] sm:$0xff] }
 0x1b2   :  { %v442_v58 = vmul.f32 1.442695, %v441_v55 }
 0x1b3   :  { %v180_v30 = vpop.f32.mrf.mxu0 }
 0x1b4   :  { %v1034_v30 = vld [vmem:[%s1465_s6 + $0x30] sm:$0xff] }
 0x1b5   :  { %645 = vmatpush.bf16.msra.mxu3 %v1034_v30 }
 0x21b   :  { %v454_v31 = vpop.xlane.xlu1 %453 }
 0x21c   :  { %v455_v32 = vmul.f32 %v454_v31, %v1199_v23  ;;  %v1039_v31 = vld [vmem:[%s1465_s6 + $0x58] sm:$0xff] }
 0x21d   :  { %v459_v33 = vpop.xlane.xlu0 %458  ;;  %661 = vmatpush.bf16.msrb.mxu2 %v1039_v31 }
 0x21e   :  { %v461_v34 = vmul.f32 %v455_v32, %v455_v32  ;;  %v460_v35 = vmul.f32 %v459_v33, %v1199_v23  ;;  %v464_v63 = vsub.f32 %v1314_v17, %v455_v32  ;;  %v1033_v32 = vld [vmem:[%s1465_s6 + $0x28] sm:$0xff]  ;;  %v428_v33 = vperm.slane %v1274_v29, 5 }
 0x21f   :  { %646 = vmatpush.bf16.msra.mxu3 %v1033_v32  ;;  %v1037_v29 = vld [vmem:[%s1465_s6 + $0x48] sm:$0xff] }
 0x220   :  { %v462_v36 = vsub.f32 %v460_v35, %v461_v34  ;;  %v1038_v34 = vld [vmem:[%s1465_s6 + $0x50] sm:$0xff]  ;;  %v1032_v35 = vld [vmem:[%s1465_s6 + $0x20] sm:$0xff] }
 0x221   :  { %662 = vmatpush.bf16.msrb.mxu2 %v1038_v34 }
 0x222   :  { %v463_v37 = vmax.f32 %v462_v36, 0.0  ;;  %v387_v38 = vpop.xlane.xlu2 %386 }
 0x223   :  { %v388_v40 = vmul.f32 %v387_v38, %v1199_v23  ;;  %647 = vmatpush.bf16.msra.mxu3 %v1032_v35  ;;  %v1031_v38 = vld [vmem:[%s1465_s6 + $0x18] sm:$0xff] }
 0x224   :  { %v465_v41 = vadd.f32 1e-05, %v463_v37  ;;  %v392_v43 = vpop.xlane.xlu1 %391  ;;  %v1023_v37 = vld [vmem:[%s1464_s5 + $0x38] sm:$0xff] }
 0x225   :  { %v394_v44 = vmul.f32 %v388_v40, %v388_v40  ;;  %v393_v45 = vmul.f32 %v392_v43, %v1199_v23  ;;  %v397_v14 = vsub.f32 %v1322_v25, %v388_v40  ;;  %745 = vmatpush.bf16.msrb.mxu0 %v1023_v37  ;;  %663 = vmatpush.bf16.msrb.mxu2 %v1037_v29  ;;  %v1022_v40 = vld [vmem:[%s1464_s5 + $0x30] sm:$0xff]  ;;  %v1036_v43 = vld [vmem:[%s1465_s6 + $0x40] sm:$0xff]  ;;  %v771_v37 = vperm.slane %v1299_v42, 2 }
 0x226   :  { %1071 = vrsqrt.f32 %v465_v41  ;;  %vm472_vm1 = vweird.f32 %v465_v41 }
 0x227   :  { %v395_v47 = vsub.f32 %v393_v45, %v394_v44  ;;  %648 = vmatpush.bf16.msra.mxu3 %v1031_v38  ;;  %v1030_v44 = vld [vmem:[%s1465_s6 + $0x10] sm:$0xff] }
 0x229   :  { %v396_v48 = vmax.f32 %v395_v47, 0.0  ;;  %746 = vmatpush.bf16.msrb.mxu0 %v1022_v40  ;;  %664 = vmatpush.bf16.msrb.mxu2 %v1036_v43  ;;  %v1029_v47 = vld [vmem:[%s1465_s6 + $0x8] sm:$0xff] }
 0x22b   :  { %v398_v52 = vadd.f32 1e-05, %v396_v48  ;;  %649 = vmatpush.bf16.msra.mxu3 %v1030_v44  ;;  %v1020_v48 = vld [vmem:[%s1464_s5 + $0x20] sm:$0xff] }
 0x22c   :  { %v1072_v53 = vpop.eup %1071 }
 0x22d   :  { %v467_v54 = vmul.f32 %v1072_v53, %v465_v41  ;;  %1073 = vrsqrt.f32 %v398_v52  ;;  %vm473_vm0 = vweird.f32 %v1072_v53  ;;  %vm405_vm4 = vweird.f32 %v398_v52  ;;  %747 = vmatpush.bf16.msrb.mxu0 %v1021_v46 }
 0x22e   :  { %1075 = vpow2.f32 %v507_v50  ;;  %vm474_vm2 = vmor %vm472_vm1, %vm473_vm0 }
 0x22f   :  { %v468_v56 = vmul.f32 %v1072_v53, %v467_v54  ;;  %1077 = vpow2.f32 %v442_v58  ;;  %650 = vmatpush.bf16.msra.mxu3 %v1029_v47  ;;  %v1019_v54 = vld [vmem:[%s1464_s5 + $0x18] sm:$0xff] }
 0x231   :  { %v469_v57 = vmul.f32 0.5, %v468_v56  ;;  %748 = vmatpush.bf16.msrb.mxu0 %v1020_v48  ;;  %v1018_v56 = vld [vmem:[%s1464_s5 + $0x10] sm:$0xff] }
 0x233   :  { %v1074_v59 = vpop.eup %1073  ;;  %v470_v60 = vsub.f32 1.5, %v469_v57 }
 0x234   :  { %v1076_v23 = vpop.eup %1075  ;;  %v400_v61 = vmul.f32 %v1074_v59, %v398_v52  ;;  %vm406_vm3 = vweird.f32 %v1074_v59  ;;  %v1028_v52 = vld [vmem:[%s1465_s6] sm:$0xff] }
 0x235   :  { %v471_v62 = vmul.f32 %v1072_v53, %v470_v60  ;;  %v509_v5 = vadd.f32 1.0, %v1076_v23  ;;  %v1078_v11 = vpop.eup %1077  ;;  %vm407_vm5 = vmor %vm405_vm4, %vm406_vm3  ;;  %651 = vmatpush.bf16.msra.mxu3 %v1028_v52  ;;  %749 = vmatpush.bf16.msrb.mxu0 %v1019_v54 }
 0x236   :  { %v401_v2 = vmul.f32 %v1074_v59, %v400_v61  ;;  %v444_v1 = vadd.f32 1.0, %v1078_v11  ;;  %v1017_v61 = vld [vmem:[%s1464_s5 + $0x8] sm:$0xff] }
 0x237   :  { %v475_v4 = vsel %vm474_vm2, %v1072_v53, %v471_v62  ;;  %1079 = vrcp.f32 %v509_v5  ;;  %v1016_v62 = vld [vmem:[%s1464_s5] sm:$0xff] }
 0x238   :  { %v476_v6 = vmul.f32 %v475_v4, %v464_v63  ;;  %v402_v7 = vmul.f32 0.5, %v401_v2  ;;  %1081 = vrcp.f32 %v444_v1  ;;  %v427_v4 = vperm.slane %v1299_v42, 5 }
 0x239   :  { %750 = vmatpush.bf16.msrb.mxu0 %v1018_v56 }
 0x23a   :  { %v403_v9 = vsub.f32 1.5, %v402_v7  ;;  %v478_v10 = vmul.f32 %v477_v3, %v476_v6 }
 0x23c   :  { %v404_v12 = vmul.f32 %v1074_v59, %v403_v9  ;;  %v1338_v13 = vadd.f32 %v479_v8, %v478_v10 }
 0x23d   :  { %v1080_v19 = vpop.eup %1079  ;;  %751 = vmatpush.bf16.msrb.mxu0 %v1017_v61 }
 0x23e   :  { %v408_v15 = vsel %vm407_vm5, %v1074_v59, %v404_v12  ;;  %488 = vrot.lane.b32.xlu1 %v1338_v13, %s1129_s9  ;;  %485 = vrot.lane.b32.xlu2 %v1338_v13, %s1132_s12  ;;  %v511_v22 = vmul.f32 %v1080_v19, %v1314_v17  ;;  %v1082_v24 = vpop.eup %1081  ;;  %v1026_v17 = vld [vmem:[%s1464_s5 + $0x50] sm:$0xff]  ;;  %v495_v53 = vsub.f32 %v1338_v13, %v428_v33 }
 0x23f   :  { %v409_v16 = vmul.f32 %v408_v15, %v397_v14  ;;  %482 = vrot.lane.b32.xlu0 %v1338_v13, %s1130_s10  ;;  %v446_v26 = vmul.f32 %v1082_v24, %v1322_v25  ;;  %763 = vmatpush.bf16.msrb.mxu1 %v1026_v17  ;;  %v1025_v25 = vld [vmem:[%s1464_s5 + $0x48] sm:$0xff] }
 0x240   :  { %v497_v55 = vmul.f32 %v495_v53, %v495_v53 }
 0x241   :  { %v411_v20 = vmul.f32 %v410_v0, %v409_v16  ;;  %752 = vmatpush.bf16.msrb.mxu0 %v1016_v62 }
 0x242   :  { %v499_v23 = vsub.f32 0.0, %v497_v55 }
 0x243   :  { %v1349_v21 = vadd.f32 %v412_v18, %v411_v20  ;;  %764 = vmatpush.bf16.msrb.mxu1 %v1025_v25 }
 0x244   :  { %v502_v63 = vmul.f32 1.442695, %v499_v23 }
 0x245   :  { %v430_v36 = vsub.f32 %v1349_v21, %v428_v33 }
 0x246   :  { %513 = vrot.lane.b32.xlu1 %v511_v22, %s1130_s10  ;;  %418 = vrot.lane.b32.xlu2 %v1349_v21, %s1132_s12 }
 0x247   :  { %415 = vrot.lane.b32.xlu0 %v1349_v21, %s1130_s10  ;;  %765 = vmatpush.bf16.msrb.mxu1 %v1024_v28  ;;  %v432_v39 = vmul.f32 %v430_v36, %v430_v36 }
 0x249   :  { %v434_v45 = vsub.f32 0.0, %v432_v39 }
 0x24b   :  { %v437_v49 = vmul.f32 1.442695, %v434_v45 }
 0x24d   :  { %1083 = vpow2.f32 %v437_v49 }
 0x24e   :  { %448 = vrot.lane.b32.xlu2 %v446_v26, %s1130_s10  ;;  %1085 = vpow2.f32 %v502_v63 }
 0x24f   :  { %421 = vrot.lane.b32.xlu0 %v1349_v21, %s1129_s9 }
 0x253   :  { %v1084_v57 = vpop.eup %1083 }
 0x254   :  { %v1086_v10 = vpop.eup %1085 }
 0x298   :  { %v486_v41 = vpop.permute.xlu2 %485 }
 0x2a0   :  { %v419_v50 = vpop.permute.xlu2 %418 }
 0x2a8   :  { %v449_v58 = vpop.permute.xlu2 %448 }
 0x2a9   :  { %v451_v59 = vsel %vm89_vm10, %v1084_v57, %v449_v58 }
 0x2aa   :  { %v518_v60 = vpack.c.bf16 %v451_v59, %v451_v59 }
 0x2ac   :  { %995 = vmatmul.msk.bf16.vlgmr.msrb.gmra.mxu1 %vm93_vm11, %v518_v60 }
 0x2b0   :  { %v489_v2 = vpop.permute.xlu1 %488 }
 0x2b1   :  { %v483_v3 = vpop.permute.xlu0 %482 }
 0x2b2   :  { %v491_v5 = vsel %vm89_vm10, %v1338_v13, %v483_v3 }
 0x2b3   :  { %v492_v6 = vsel %vm93_vm11, %v491_v5, %v486_v41 }
 0x2b4   :  { %v493_v7 = vsel %vm165_vm12, %v492_v6, %v489_v2 }
 0x2b5   :  { %v494_v8 = vsub.f32 %v493_v7, %v427_v4 }
 0x2b7   :  { %v496_v9 = vmul.f32 %v494_v8, %v494_v8 }
 0x2b8   :  { %v514_v11 = vpop.permute.xlu1 %513 }
 0x2b9   :  { %v498_v12 = vsub.f32 0.0, %v496_v9  ;;  %v416_v14 = vpop.permute.xlu0 %415  ;;  %v516_v0 = vsel %vm89_vm10, %v1086_v10, %v514_v11 }
 0x2ba   :  { %v544_v15 = vpack.c.bf16 %v516_v0, %v516_v0  ;;  %v424_v13 = vsel %vm89_vm10, %v1349_v21, %v416_v14 }
 0x2bb   :  { %v500_v16 = vmul.f32 1.442695, %v498_v12  ;;  %v425_v18 = vsel %vm93_vm11, %v424_v13, %v419_v50  ;;  %v33_v50 = vld [vmem:[%s1461_s2] sm:$0x3] }
 0x2bc   :  { %946 = vmatmul.msk.bf16.vlgmr.msrb.gmra.mxu2 %vm93_vm11, %v544_v15 }
 0x2bd   :  { %1087 = vpow2.f32 %v500_v16 }
 0x2c1   :  { %v422_v1 = vpop.permute.xlu0 %421 }
 0x2c2   :  { %v426_v19 = vsel %vm165_vm12, %v425_v18, %v422_v1 }
 0x2c3   :  { %v1088_v20 = vpop.eup %1087  ;;  %v429_v22 = vsub.f32 %v426_v19, %v427_v4 }
 0x2c4   :  { %v543_v24 = vpack.c.bf16 %v1088_v20, %v1088_v20 }
 0x2c5   :  { %v431_v26 = vmul.f32 %v429_v22, %v429_v22 }
 0x2c6   :  { %652 = vmatmul.bf16.vlgmr.msra.gmra.mxu3 %v543_v24 }
 0x2c7   :  { %v433_v51 = vsub.f32 0.0, %v431_v26 }
 0x2c9   :  { %v435_v17 = vmul.f32 1.442695, %v433_v51 }
 0x2cb   :  { %1089 = vpow2.f32 %v435_v17 }
 0x2d1   :  { %v1090_v27 = vpop.eup %1089 }
 0x2d2   :  { %v517_v25 = vpack.c.bf16 %v1090_v27, %v1090_v27 }
 0x2d4   :  { %753 = vmatmul.bf16.vlgmr.msrb.gmra.mxu0 %v517_v25 }
 0x329   :  { %v767_v28 = vpop.f32.mrf.mxu1 }
 0x331   :  { %v769_v30 = vpop.f32.mrf.mxu1 }
 0x33f   :  { %v666_v31 = vpop.f32.mrf.mxu2 }
 0x347   :  { %v668_v21 = vpop.f32.mrf.mxu2 }
 0x349   :  { %v653_v32 = vpop.f32.mrf.mxu3 }
 0x34a   :  { %v667_v33 = vadd.f32 %v666_v31, %v653_v32 }
 0x351   :  { %v655_v34 = vpop.f32.mrf.mxu3  ;;  %v754_v35 = vpop.f32.mrf.mxu0 }
 0x352   :  { %v755_v36 = vadd.f32 %v754_v35, %v667_v33 }
 0x354   :  { %v768_v29 = vadd.f32 %v767_v28, %v755_v36 }
 0x356   :  { %v772_v38 = vadd.f32 %v771_v37, %v768_v29 }
 0x358   :  { %v996_v39 = vclamps-f32 %v772_v38, 20.0 }
 0x359   :  { %v756_v40 = vpop.f32.mrf.mxu0 }
 0x35a   :  { %v775_v41 = vsub.f32 0.0, %v996_v39 }
 0x35c   :  { %v776_v43 = vmul.f32 1.442695, %v775_v41 }
 0x35e   :  { %1091 = vpow2.f32 %v776_v43 }
 0x364   :  { %v1092_v44 = vpop.eup %1091 }
 0x365   :  { %v780_v45 = vmul.f32 %v1092_v44, %v1092_v44  ;;  %v778_v47 = vadd.f32 1.0, %v1092_v44 }
 0x367   :  { %v782_v46 = vadd.f32 1.0, %v780_v45  ;;  %v781_v48 = vsub.f32 1.0, %v780_v45 }
 0x369   :  { %1093 = vrcp.f32 %v782_v46 }
 0x36a   :  { %1095 = vrcp.f32 %v778_v47 }
 0x36f   :  { %v1094_v49 = vpop.eup %1093 }
 0x370   :  { %v784_v42 = vmul.f32 %v1094_v49, %v781_v48  ;;  %v1096_v53 = vpop.eup %1095 }
 0x372   :  { %v785_v52 = vadd.f32 %v784_v42, %v33_v50 }
 0x374   :  { %v786_v54 = vmul.f32 %v1096_v53, %v785_v52 }
 0x376   :  { %798 = vrot.lane.b32.xlu0 %v786_v54, %s1130_s10  ;;  %v997_v55 = vclamps-f32 %v786_v54, 20.0 }
 0x378   :  { %v789_v56 = vmul.f32 -2.0, %v997_v55 }
 0x37a   :  { %v790_v57 = vmul.f32 1.442695, %v789_v56 }
 0x37c   :  { %1097 = vpow2.f32 %v790_v57 }
 0x382   :  { %v1098_v58 = vpop.eup %1097 }
 0x383   :  { %v793_v59 = vadd.f32 1.0, %v1098_v58  ;;  %v792_v60 = vsub.f32 1.0, %v1098_v58 }
 0x385   :  { %1099 = vrcp.f32 %v793_v59 }
 0x38b   :  { %v1100_v23 = vpop.eup %1099 }
 0x38c   :  { %v795_v61 = vmul.f32 %v1100_v23, %v792_v60 }
 0x38e   :  { %v796_v62 = vmul.f32 %v1096_v53, %v795_v61 }
 0x3e8   :  { %v799_v63 = vpop.permute.xlu0 %798 }
 0x3e9   :  { %v801_v2 = vsel %vm89_vm10, %v796_v62, %v799_v63 }
 0x3ea   :  { %v802_v3 = vsel %vm93_vm11, %v801_v2, 0.0 }
 0x3eb   :  { %803 = vst [vmem:[#allocation2] sm:$0x3] %v802_v3 }
 0x3ec   :  { %814 = dma.vmem_to_hbm [thread:$0]  %s810_s0, 32, %s812_s1, [#allocation3]  }
 0x3ed   :  { %1125 = dma.done.wait [#allocation3], 32  }
 0x3ee   :  { %1126 = vsyncadd [#allocation3], 4294967264 }
 0x3ef   :  { %819 = vsyncpa [#allocation3], 1 }

</bundles_post_ra>
